<compile_context>
chip_gen: v7x
topology: tpu7x:2x2x1
jax: 0.10.0
libtpu: 0.0.40
codegen_flags: <defaults>
</compile_context>

<pallas_src>
import functools

import numpy as np
import jax
import jax.numpy as jnp
from jax.experimental import pallas as pl
from jax.experimental.pallas import tpu as pltpu

HIDDEN = 256
_LANES = 128
_SUBLANES = 8


# --------------------------------------------------------------------------- kernel
def combined_agent_kernel(x_ref, w1_ref, b1_ref, w2_ref, b2_ref, wh_ref, bh_ref,
                          mask_ref, out_ref):
    """One batch tile: two ReLU layers, then a single fused (mean|sigma|value) head."""
    w_dtype = w1_ref.dtype  # MXU input dtype (bf16 by default); accumulation stays f32.

    h1 = jnp.dot(x_ref[...], w1_ref[...], preferred_element_type=jnp.float32) + b1_ref[...]
    h1 = jnp.maximum(h1, 0.0)

    h2 = jnp.dot(h1.astype(w_dtype), w2_ref[...], preferred_element_type=jnp.float32) + b2_ref[...]
    h2 = jnp.maximum(h2, 0.0)

    # Fused heads: columns [0, A) = mean, [A, 2A) = sigma (pre-activation),
    # [2A, 2A+1) = value, rest = zero padding to the 128-lane boundary.
    s = jnp.dot(h2.astype(w_dtype), wh_ref[...], preferred_element_type=jnp.float32) + bh_ref[...]

    # mask is a precomputed (1, head_pad) f32 {0,1} row selecting the sigma columns.
    # Masking the sigmoid argument keeps exp() finite on mean/value/padding columns.
    mask = mask_ref[...]
    sig = pl.reciprocal(1.0 + jnp.exp(-(s * mask)), approx=True)   # exp + vrcp on EUP
    out_ref[...] = (s + mask * (sig - s)).astype(out_ref.dtype)


# ------------------------------------------------------- Buffered(1) feature probe
def _probe_kernel(x_ref, w_ref, o_ref):
    o_ref[...] = x_ref[...] + w_ref[...]


@functools.lru_cache(maxsize=None)
def _single_buffer_supported():
    """Detect once whether pl.Buffered(buffer_count=1) const-weight specs lower and
    run correctly on this JAX/libtpu; result-checked so a silently-wrong path also
    falls back to default double-buffered specs."""
    try:
        x = jnp.zeros((16, 128), jnp.float32)
        w = jnp.ones((8, 128), jnp.float32)
        out = pl.pallas_call(
            _probe_kernel,
            out_shape=jax.ShapeDtypeStruct((16, 128), jnp.float32),
            grid=(2,),
            in_specs=[pl.BlockSpec((8, 128), lambda i: (i, 0)),
                      pl.BlockSpec((8, 128), lambda i: (0, 0),
                                   pipeline_mode=pl.Buffered(1))],
            out_specs=pl.BlockSpec((8, 128), lambda i: (i, 0)),
        )(x, w)
        return bool(jnp.all(out == 1.0))
    except Exception:
        return False


# ----------------------------------------------------------------- one-time prep
def prepare_params(params, mxu_dtype=jnp.bfloat16):
    """One-time parameter preparation: fuse the 3 heads into a lane-dense
    (HIDDEN, >=128) slab, pad, cast MXU inputs to `mxu_dtype`, build the sigma mask.
    Do this once per parameter update, NOT per forward call."""
    act_dim = params["wm"].shape[1]

    wh = jnp.concatenate([params["wm"], params["ws"], params["wv"]], axis=1)
    bh = jnp.concatenate([params["bm"], params["bs"], params["bv"]], axis=1)
    head_dim = 2 * act_dim + 1
    head_pad = max(_LANES, -(-head_dim // _LANES) * _LANES)
    if head_pad != head_dim:
        wh = jnp.pad(wh, ((0, 0), (0, head_pad - head_dim)))
        bh = jnp.pad(bh, ((0, 0), (0, head_pad - head_dim)))

    col = np.arange(head_pad)
    sigma_mask = jnp.asarray(((col >= act_dim) & (col < 2 * act_dim))[None, :],
                             jnp.float32)

    return {
        "w1": jnp.asarray(params["w1"], mxu_dtype),
        "b1": jnp.asarray(params["b1"], jnp.float32),
        "w2": jnp.asarray(params["w2"], mxu_dtype),
        "b2": jnp.asarray(params["b2"], jnp.float32),
        "wh": jnp.asarray(wh, mxu_dtype),
        "bh": jnp.asarray(bh, jnp.float32),
        "sigma_mask": sigma_mask,
        "act_dim": int(act_dim),          # python ints: static metadata
        "head_pad": int(head_pad),
    }


def _round_up(n, m):
    return -(-n // m) * m


def _choose_tile_b(B, small_single_tile=256, max_tile=512):
    """Pick the batch tile: minimal (sublane-aligned) padding, and >=2 grid steps for
    larger batches so the 'parallel' axis can shard across v7x's two TensorCores."""
    if B <= small_single_tile:
        return _round_up(B, _SUBLANES)               # single tile, <=7 padded rows
    n_tiles = max(2, pl.cdiv(B, max_tile))           # >=2 -> second TC gets work
    return min(max_tile, _round_up(pl.cdiv(B, n_tiles), _SUBLANES))


# --------------------------------------------------------------------- jitted call
@functools.partial(jax.jit,
                   static_argnames=("act_dim", "tile_b", "single_buffer", "out_dtype"))
def _forward_jit(x, w1, b1, w2, b2, wh, bh, sigma_mask, *,
                 act_dim, tile_b, single_buffer, out_dtype):
    B, obs_dim = x.shape
    head_pad = wh.shape[1]

    bp = pl.cdiv(B, tile_b) * tile_b
    x_pad = x if bp == B else jnp.pad(x, ((0, bp - B), (0, 0)))
    x_pad = x_pad.astype(w1.dtype)

    if single_buffer:
        # Constant block index across the grid: one pipeline buffer (no re-DMA,
        # halves weight VMEM vs. the default 2-deep pipeline).
        def const_spec(shape):
            return pl.BlockSpec(shape, lambda i: (0, 0), pipeline_mode=pl.Buffered(1))
    else:
        def const_spec(shape):
            return pl.BlockSpec(shape, lambda i: (0, 0))

    in_specs = [
        pl.BlockSpec((tile_b, obs_dim), lambda i: (i, 0)),          # x (batch-tiled)
        const_spec((obs_dim, HIDDEN)), const_spec((1, HIDDEN)),     # W1, b1
        const_spec((HIDDEN, HIDDEN)), const_spec((1, HIDDEN)),      # W2, b2
        const_spec((HIDDEN, head_pad)), const_spec((1, head_pad)),  # fused head W, b
        const_spec((1, head_pad)),                                  # sigma mask
    ]
    out_specs = pl.BlockSpec((tile_b, head_pad), lambda i: (i, 0))  # lane-dense slab

    out = pl.pallas_call(
        combined_agent_kernel,
        out_shape=jax.ShapeDtypeStruct((bp, head_pad), out_dtype),
        grid_spec=pltpu.PrefetchScalarGridSpec(
            num_scalar_prefetch=0,
            grid=(bp // tile_b,),
            in_specs=in_specs,
            out_specs=out_specs,
        ),
        compiler_params=pltpu.CompilerParams(
            dimension_semantics=("parallel",),        # batch axis -> megacore on v7x
        ),
    )(x_pad, w1, b1, w2, b2, wh, bh, sigma_mask)

    mean = out[:B, :act_dim].astype(jnp.float32)
    sigma = out[:B, act_dim:2 * act_dim].astype(jnp.float32)
    value = out[:B, 2 * act_dim:2 * act_dim + 1].astype(jnp.float32)
    return mean, sigma, value


def combined_agent_forward(x, prepared, *, tile_b=None, out_dtype=jnp.float32):
    """x: (B, obs_dim). prepared: output of prepare_params(). Returns (mean, sigma, value)."""
    x = jnp.asarray(x)
    B = x.shape[0]
    if tile_b is None:
        tile_b = _choose_tile_b(B)
    return _forward_jit(
        x, prepared["w1"], prepared["b1"], prepared["w2"], prepared["b2"],
        prepared["wh"], prepared["bh"], prepared["sigma_mask"],
        act_dim=prepared["act_dim"], tile_b=int(tile_b),
        single_buffer=_single_buffer_supported(), out_dtype=out_dtype)


# -------------------------------------------------------------- init + reference
def init_params(key, obs_dim, act_dim):
    """Parameter init mirroring the PyTorch module: linear1/linear2 orthogonal
    (gain sqrt(2)) + zero bias, heads use PyTorch default Linear init.
    Weights stored as (in_features, out_features)."""
    k1, k2, km_w, km_b, ks_w, ks_b, kv_w, kv_b = jax.random.split(key, 8)
    ortho = jax.nn.initializers.orthogonal(scale=np.sqrt(2.0))

    def default_linear(kw, kb, fan_in, fan_out):
        bound = 1.0 / np.sqrt(fan_in)
        w = jax.random.uniform(kw, (fan_in, fan_out), jnp.float32, -bound, bound)
        b = jax.random.uniform(kb, (1, fan_out), jnp.float32, -bound, bound)
        return w, b

    params = {}
    params["w1"] = ortho(k1, (obs_dim, HIDDEN), jnp.float32)
    params["b1"] = jnp.zeros((1, HIDDEN), jnp.float32)
    params["w2"] = ortho(k2, (HIDDEN, HIDDEN), jnp.float32)
    params["b2"] = jnp.zeros((1, HIDDEN), jnp.float32)
    params["wm"], params["bm"] = default_linear(km_w, km_b, HIDDEN, act_dim)
    params["ws"], params["bs"] = default_linear(ks_w, ks_b, HIDDEN, act_dim)
    params["wv"], params["bv"] = default_linear(kv_w, kv_b, HIDDEN, 1)
    return params


def reference_forward(x, p):
    h1 = jnp.maximum(x @ p["w1"] + p["b1"], 0.0)
    h2 = jnp.maximum(h1 @ p["w2"] + p["b2"], 0.0)
    mean = h2 @ p["wm"] + p["bm"]
    sigma = jax.nn.sigmoid(h2 @ p["ws"] + p["bs"])
    value = h2 @ p["wv"] + p["bv"]
    return mean, sigma, value


# ---------------------------------------------------------------------------- main
if __name__ == "__main__":
    key = jax.random.PRNGKey(0)
    k_param, k_x = jax.random.split(key)

    B, OBS_DIM, ACT_DIM = 16, 32, 8   # small env-like shapes
    params = init_params(k_param, OBS_DIM, ACT_DIM)
    x = jax.random.normal(k_x, (B, OBS_DIM), jnp.float32)
    mean_r, sigma_r, value_r = reference_forward(x, params)

    # --- default path: bf16 MXU inputs (f32 accumulation) ------------------------
    prepared_bf16 = prepare_params(params)                       # default bf16
    mean, sigma, value = combined_agent_forward(x, prepared_bf16)
    jax.block_until_ready((mean, sigma, value))
    np.testing.assert_allclose(np.asarray(mean), np.asarray(mean_r), atol=3e-2, rtol=3e-2)
    np.testing.assert_allclose(np.asarray(sigma), np.asarray(sigma_r), atol=1e-2, rtol=1e-2)
    np.testing.assert_allclose(np.asarray(value), np.asarray(value_r), atol=3e-2, rtol=3e-2)
    assert mean.shape == (B, ACT_DIM) and sigma.shape == (B, ACT_DIM) and value.shape == (B, 1)

    # --- f32 MXU path, forced multi-tile grid (exercises const-weight revisiting) -
    prepared_f32 = prepare_params(params, mxu_dtype=jnp.float32)
    mean2, sigma2, value2 = combined_agent_forward(x, prepared_f32, tile_b=8)
    jax.block_until_ready((mean2, sigma2, value2))
    np.testing.assert_allclose(np.asarray(mean2), np.asarray(mean_r), atol=1e-3, rtol=1e-3)
    np.testing.assert_allclose(np.asarray(sigma2), np.asarray(sigma_r), atol=5e-3, rtol=5e-3)
    np.testing.assert_allclose(np.asarray(value2), np.asarray(value_r), atol=1e-3, rtol=1e-3)

    print("KERNEL_OK")
</pallas_src>

<mosaic_0001>
module attributes {stable_mosaic.version = 11 : i64} {
  func.func @_probe_kernel(%arg0: i32, %arg1: memref<8x128xf32, #tpu.memory_space<vmem>>, %arg2: memref<8x128xf32, #tpu.memory_space<vmem>>, %arg3: memref<8x128xf32, #tpu.memory_space<vmem>>) attributes {dimension_semantics = [#tpu.dimension_semantics<arbitrary>], iteration_bounds = array<i64: 2>, scalar_prefetch = 0 : i64, scratch_operands = 0 : i64, tpu.core_type = #tpu.core_type<tc>, window_params = [{transform_indices = @transform_0, window_bounds = array<i64: 8, 128>}, {pipeline_mode = #tpu.pipeline_mode<synchronous>, transform_indices = @transform_1, window_bounds = array<i64: 8, 128>}, {transform_indices = @transform_2, window_bounds = array<i64: 8, 128>}]} {
    %c0 = arith.constant 0 : index
    %c0_0 = arith.constant 0 : index
    %0 = vector.load %arg1[%c0, %c0_0] : memref<8x128xf32, #tpu.memory_space<vmem>>, vector<8x128xf32>
    %c0_1 = arith.constant 0 : index
    %c0_2 = arith.constant 0 : index
    %1 = vector.load %arg2[%c0_1, %c0_2] : memref<8x128xf32, #tpu.memory_space<vmem>>, vector<8x128xf32>
    %2 = arith.addf %0, %1 : vector<8x128xf32>
    %c0_3 = arith.constant 0 : index
    %c0_4 = arith.constant 0 : index
    %3 = vector.load %arg3[%c0_3, %c0_4] : memref<8x128xf32, #tpu.memory_space<vmem>>, vector<8x128xf32>
    tpu.vector_store %arg3[%c0_3, %c0_4], %2 {strides = array<i32>} : memref<8x128xf32, #tpu.memory_space<vmem>>, vector<8x128xf32>,
    return
  }
  func.func @transform_0(%arg0: i32) -> (i32, i32) {
    %c0_i32 = arith.constant 0 : i32
    %c0_i32_0 = arith.constant 0 : i32
    return %arg0, %c0_i32 : i32, i32
  }
  func.func @transform_1(%arg0: i32) -> (i32, i32) {
    %c0_i32 = arith.constant 0 : i32
    %c0_i32_0 = arith.constant 0 : i32
    %c0_i32_1 = arith.constant 0 : i32
    return %c0_i32, %c0_i32_0 : i32, i32
  }
  func.func @transform_2(%arg0: i32) -> (i32, i32) {
    %c0_i32 = arith.constant 0 : i32
    %c0_i32_0 = arith.constant 0 : i32
    return %arg0, %c0_i32 : i32, i32
  }
}

module attributes {stable_mosaic.version = 11 : i64} {
  func.func @combined_agent_kernel(%arg0: i32, %arg1: memref<16x32xbf16, #tpu.memory_space<vmem>>, %arg2: memref<32x256xbf16, #tpu.memory_space<vmem>>, %arg3: memref<1x256xf32, #tpu.memory_space<vmem>>, %arg4: memref<256x256xbf16, #tpu.memory_space<vmem>>, %arg5: memref<1x256xf32, #tpu.memory_space<vmem>>, %arg6: memref<256x128xbf16, #tpu.memory_space<vmem>>, %arg7: memref<1x128xf32, #tpu.memory_space<vmem>>, %arg8: memref<1x128xf32, #tpu.memory_space<vmem>>, %arg9: memref<16x128xf32, #tpu.memory_space<vmem>>) attributes {dimension_semantics = [#tpu.dimension_semantics<parallel>], iteration_bounds = array<i64: 1>, scalar_prefetch = 0 : i64, scratch_operands = 0 : i64, tpu.core_type = #tpu.core_type<tc>, window_params = [{transform_indices = @transform_0, window_bounds = array<i64: 16, 32>}, {pipeline_mode = #tpu.pipeline_mode<synchronous>, transform_indices = @transform_1, window_bounds = array<i64: 32, 256>}, {pipeline_mode = #tpu.pipeline_mode<synchronous>, transform_indices = @transform_2, window_bounds = array<i64: 1, 256>}, {pipeline_mode = #tpu.pipeline_mode<synchronous>, transform_indices = @transform_3, window_bounds = array<i64: 256, 256>}, {pipeline_mode = #tpu.pipeline_mode<synchronous>, transform_indices = @transform_4, window_bounds = array<i64: 1, 256>}, {pipeline_mode = #tpu.pipeline_mode<synchronous>, transform_indices = @transform_5, window_bounds = array<i64: 256, 128>}, {pipeline_mode = #tpu.pipeline_mode<synchronous>, transform_indices = @transform_6, window_bounds = array<i64: 1, 128>}, {pipeline_mode = #tpu.pipeline_mode<synchronous>, transform_indices = @transform_7, window_bounds = array<i64: 1, 128>}, {transform_indices = @transform_8, window_bounds = array<i64: 16, 128>}]} {
    %c0 = arith.constant 0 : index
    %c0_0 = arith.constant 0 : index
    %0 = vector.load %arg1[%c0, %c0_0] : memref<16x32xbf16, #tpu.memory_space<vmem>>, vector<16x32xbf16>
    %c0_1 = arith.constant 0 : index
    %c0_2 = arith.constant 0 : index
    %1 = vector.load %arg2[%c0_1, %c0_2] : memref<32x256xbf16, #tpu.memory_space<vmem>>, vector<32x256xbf16>
    %cst = arith.constant dense<0.000000e+00> : vector<16x256xf32>
    %2 = tpu.matmul %0, %1, %cst {dimension_numbers = #tpu.dot_dimension_numbers<[1], [0], [0], [1], [0, 0, 1, 1], [], []>} : vector<16x32xbf16>, vector<32x256xbf16>, vector<16x256xf32> -> vector<16x256xf32>
    %c0_3 = arith.constant 0 : index
    %c0_4 = arith.constant 0 : index
    %3 = vector.load %arg3[%c0_3, %c0_4] : memref<1x256xf32, #tpu.memory_space<vmem>>, vector<1x256xf32>
    %4 = vector.broadcast %3 : vector<1x256xf32> to vector<16x256xf32>
    %5 = arith.addf %2, %4 : vector<16x256xf32>
    %cst_5 = arith.constant 0.000000e+00 : f32
    %6 = vector.broadcast %cst_5 : f32 to vector<16x256xf32>
    %7 = arith.maximumf %5, %6 : vector<16x256xf32>
    %8 = arith.truncf %7 : vector<16x256xf32> to vector<16x256xbf16>
    %c0_6 = arith.constant 0 : index
    %c0_7 = arith.constant 0 : index
    %9 = vector.load %arg4[%c0_6, %c0_7] : memref<256x256xbf16, #tpu.memory_space<vmem>>, vector<256x256xbf16>
    %cst_8 = arith.constant dense<0.000000e+00> : vector<16x256xf32>
    %10 = tpu.matmul %8, %9, %cst_8 {dimension_numbers = #tpu.dot_dimension_numbers<[1], [0], [0], [1], [0, 0, 1, 1], [], []>} : vector<16x256xbf16>, vector<256x256xbf16>, vector<16x256xf32> -> vector<16x256xf32>
    %c0_9 = arith.constant 0 : index
    %c0_10 = arith.constant 0 : index
    %11 = vector.load %arg5[%c0_9, %c0_10] : memref<1x256xf32, #tpu.memory_space<vmem>>, vector<1x256xf32>
    %12 = vector.broadcast %11 : vector<1x256xf32> to vector<16x256xf32>
    %13 = arith.addf %10, %12 : vector<16x256xf32>
    %cst_11 = arith.constant 0.000000e+00 : f32
    %14 = vector.broadcast %cst_11 : f32 to vector<16x256xf32>
    %15 = arith.maximumf %13, %14 : vector<16x256xf32>
    %16 = arith.truncf %15 : vector<16x256xf32> to vector<16x256xbf16>
    %c0_12 = arith.constant 0 : index
    %c0_13 = arith.constant 0 : index
    %17 = vector.load %arg6[%c0_12, %c0_13] : memref<256x128xbf16, #tpu.memory_space<vmem>>, vector<256x128xbf16>
    %cst_14 = arith.constant dense<0.000000e+00> : vector<16x128xf32>
    %18 = tpu.matmul %16, %17, %cst_14 {dimension_numbers = #tpu.dot_dimension_numbers<[1], [0], [0], [1], [0, 0, 1, 1], [], []>} : vector<16x256xbf16>, vector<256x128xbf16>, vector<16x128xf32> -> vector<16x128xf32>
    %c0_15 = arith.constant 0 : index
    %c0_16 = arith.constant 0 : index
    %19 = vector.load %arg7[%c0_15, %c0_16] : memref<1x128xf32, #tpu.memory_space<vmem>>, vector<1x128xf32>
    %20 = vector.broadcast %19 : vector<1x128xf32> to vector<16x128xf32>
    %21 = arith.addf %18, %20 : vector<16x128xf32>
    %c0_17 = arith.constant 0 : index
    %c0_18 = arith.constant 0 : index
    %22 = vector.load %arg8[%c0_17, %c0_18] : memref<1x128xf32, #tpu.memory_space<vmem>>, vector<1x128xf32>
    %23 = vector.broadcast %22 : vector<1x128xf32> to vector<16x128xf32>
    %24 = arith.mulf %21, %23 : vector<16x128xf32>
    %cst_19 = arith.constant 0.000000e+00 : f32
    %25 = vector.broadcast %cst_19 : f32 to vector<16x128xf32>
    %26 = arith.subf %25, %24 : vector<16x128xf32>
    %27 = math.exp %26 : vector<16x128xf32>
    %cst_20 = arith.constant 1.000000e+00 : f32
    %28 = vector.broadcast %cst_20 : f32 to vector<16x128xf32>
    %29 = arith.addf %28, %27 : vector<16x128xf32>
    %30 = tpu.reciprocal %29 {approx = true} : vector<16x128xf32> -> vector<16x128xf32>
    %31 = arith.subf %30, %21 : vector<16x128xf32>
    %32 = vector.broadcast %22 : vector<1x128xf32> to vector<16x128xf32>
    %33 = arith.mulf %32, %31 : vector<16x128xf32>
    %34 = arith.addf %21, %33 : vector<16x128xf32>
    %c0_21 = arith.constant 0 : index
    %c0_22 = arith.constant 0 : index
    %35 = vector.load %arg9[%c0_21, %c0_22] : memref<16x128xf32, #tpu.memory_space<vmem>>, vector<16x128xf32>
    tpu.vector_store %arg9[%c0_21, %c0_22], %34 {strides = array<i32>} : memref<16x128xf32, #tpu.memory_space<vmem>>, vector<16x128xf32>,
    return
  }
  func.func @transform_0(%arg0: i32) -> (i32, i32) {
    %c0_i32 = arith.constant 0 : i32
    %c0_i32_0 = arith.constant 0 : i32
    return %arg0, %c0_i32 : i32, i32
  }
  func.func @transform_1(%arg0: i32) -> (i32, i32) {
    %c0_i32 = arith.constant 0 : i32
    %c0_i32_0 = arith.constant 0 : i32
    %c0_i32_1 = arith.constant 0 : i32
    return %c0_i32, %c0_i32_0 : i32, i32
  }
  func.func @transform_2(%arg0: i32) -> (i32, i32) {
    %c0_i32 = arith.constant 0 : i32
    %c0_i32_0 = arith.constant 0 : i32
    %c0_i32_1 = arith.constant 0 : i32
    return %c0_i32, %c0_i32_0 : i32, i32
  }
  func.func @transform_3(%arg0: i32) -> (i32, i32) {
    %c0_i32 = arith.constant 0 : i32
    %c0_i32_0 = arith.constant 0 : i32
    %c0_i32_1 = arith.constant 0 : i32
    return %c0_i32, %c0_i32_0 : i32, i32
  }
  func.func @transform_4(%arg0: i32) -> (i32, i32) {
    %c0_i32 = arith.constant 0 : i32
    %c0_i32_0 = arith.constant 0 : i32
    %c0_i32_1 = arith.constant 0 : i32
    return %c0_i32, %c0_i32_0 : i32, i32
  }
  func.func @transform_5(%arg0: i32) -> (i32, i32) {
    %c0_i32 = arith.constant 0 : i32
    %c0_i32_0 = arith.constant 0 : i32
    %c0_i32_1 = arith.constant 0 : i32
    return %c0_i32, %c0_i32_0 : i32, i32
  }
  func.func @transform_6(%arg0: i32) -> (i32, i32) {
    %c0_i32 = arith.constant 0 : i32
    %c0_i32_0 = arith.constant 0 : i32
    %c0_i32_1 = arith.constant 0 : i32
    return %c0_i32, %c0_i32_0 : i32, i32
  }
  func.func @transform_7(%arg0: i32) -> (i32, i32) {
    %c0_i32 = arith.constant 0 : i32
    %c0_i32_0 = arith.constant 0 : i32
    %c0_i32_1 = arith.constant 0 : i32
    return %c0_i32, %c0_i32_0 : i32, i32
  }
  func.func @transform_8(%arg0: i32) -> (i32, i32) {
    %c0_i32 = arith.constant 0 : i32
    %c0_i32_0 = arith.constant 0 : i32
    return %arg0, %c0_i32 : i32, i32
  }
}

</mosaic_0001>

<bundles_post_ra>
// kernel: tpu_custom_call.1
= control target key start
LH: loop header
LB: loop body
LE: loop exit
PB: predicated region body
PF: predicated region fallthrough
CT: control target
= control target key end

     0   :  { %7 = vsyncpa [#allocation3], 0  ;;  %s690_s0 = inlined_call_operand.hbm [shape: f32[16,128], index: 0, kind: input, shape index: {}]   ;;  %s691_s1 = inlined_call_operand.hbm [shape: f32[8,128], index: 1, kind: input, shape index: {}]   ;;  %s692_s2 = inlined_call_operand.hbm [shape: f32[16,128], index: 2, kind: output, shape index: {}]  }
   0x1   :  { %9 = vsyncpa [#allocation3 + $0x1], 0 }
   0x2   :  { %10 = vsyncpa [#allocation6], 0 }
   0x3   :  { %11 = vsyncpa [#allocation4], 0 }
   0x4   :  { %13 = vsyncpa [#allocation4 + $0x1], 0  ;;  %s489_s9 = smov 0   ;;  %s491_s10 = smov 0  }
   0x5   :  { %s493_s11 = smov 0   ;;  %s495_s12 = smov 0  }
   0x6 LB: > { %s510_s13 = sadd.s32 4294967295, %s469_s12   ;;  %s270_s14 = sadd.s32 4294967294, %s469_s12   ;;  %s469_s12 = sphi %s495_s12, %s716_s12   ;;  %s465_s11 = sphi %s493_s11, %s715_s11   ;;  %s461_s10 = sphi %s491_s10, %s714_s10   ;;  %s457_s9 = sphi %s489_s9, %s713_s9  }
   0x7   : > { %p39_p0 = scmp.ne.s32.totalorder %s461_s10, %s457_s9  ;;  %p693_p1 = scmp.eq.s32.totalorder %s510_s13, 0 }
   0x8   : > { %p90_p3 = scmp.eq.s32.totalorder %s270_s14, 1  ;;  %p271_p5 = scmp.ge.s32.totalorder %s469_s12, 1 }
   0x9   : > { %p519_p4 = por %p693_p1, %p39_p0  ;;  %p97_p7 = scmp.lt.s32.totalorder %s469_s12, 3 }
   0xa   : > { %p524_p6 = por %p90_p3, %p39_p0  ;;  %s471_s18 = smov [#allocation5]  }
   0xb   : > { %s696_s15 = scalar_select %p519_p4, 1, 0 }
   0xc   : > { %s697_s16 = scalar_select %p524_p6, 1, 0 }
   0xd   : > { %p529_p8 = pnand %p271_p5, %p97_p7  ;;  %s110_s19 = sshll.u32 %s471_s18, 4  ;;  %s111_s19 = int_to_ptr.vmem [resolvable:$true] %s110_s19 }
   0xe   : > { %s537_s20 = sadd.s32 1, %s469_s12   ;;  %s26_s24 = sadd.s32 1, %s465_s11 }
   0xf   : > { %s698_s17 = scalar_select %p529_p8, 1, 0 }
  0x10   : > { %p292_p10 = pneg %p529_p8  ;;  %s23_s22 = ssub.s32 %s469_s12, %s537_s20 }
  0x11   : > { %p547_p12 = scmp.eq.s32.totalorder %s23_s22, 0  ;;  %s341_s27 = scalar_lea.hbm %s691_s1, 128 }
  0x12   : > { %p541_p11 = pnand %p292_p10, %p693_p1  ;;  %p342_p0 = scmp.ne.s32.totalorder %s691_s1, %s341_s27 }
  0x13   : > { %s700_s23 = scalar_select %p547_p12, 1, 0 }
  0x14   : > { %p343_p3 = pneg %p541_p11  ;;  %p348_p10 = scmp.lt.u32.totalorder %s341_s27, %s691_s1 }
  0x16   : > { %p344_p5 = pnand %p343_p3, %p342_p0 }
  0x18   : > { %p345_p7 = pneg %p344_p5 }
  0x1a   : > { %p350_p9 = pnand %p348_p10, %p345_p7 }
  0x1c   : > { %353 = shalt.err (!%p350_p9)
}
  0x1d   : > { %s354_s4 = scalar_lea.vmem %s111_s19, 128  ;;  %p362_p6 = scmp.lt.s32.totalorder %s111_s19, %s111_s19 }
  0x1e   : > { %p355_p1 = scmp.ne.s32.totalorder %s111_s19, %s354_s4  ;;  %p363_p4 = scmp.lt.s32.totalorder %s354_s4, %s354_s4 }
  0x20   : > { %p357_p2 = pnand %p355_p1, %p343_p3  ;;  %p364_p8 = por %p363_p4, %p362_p6 }
  0x22   : > { %p358_p13 = pneg %p357_p2 }
  0x24   : > { %p365_p12 = pnand %p364_p8, %p358_p13 }
  0x26   : > { %368 = shalt.err (!%p365_p12)
}
  0x27   : > { %295 = dma.hbm_to_vmem [thread:$0]  (!%p541_p11), %s691_s1, 128, %s111_s19, [#allocation6]  }
  0x28   : > { %p701_p1 = scmp.ne.s32.totalorder %s700_s23, 0  ;;  %p34_p2 = scmp.eq.s32.totalorder %s469_s12, 0 }
  0x29   : > { %p702_p4 = scmp.ne.s32.totalorder %s465_s11, %s461_s10  ;;  %p703_p6 = scmp.eq.s32.totalorder %s510_s13, 1 }
  0x2a   : > { %s573_s7 = scalar_select %p701_p1, %s465_s11, %s26_s24  }
  0x2b   : > { %p581_p8 = por %p703_p6, %p702_p4  ;;  %p305_p9 = scmp.lt.s32.totalorder %s469_s12, 2 }
  0x2c   : > { %s121_s14 = sand.u32 1, %s465_s11   ;;  %p705_p12 = pmov %p702_p4 }
  0x2d   : > { %s274_s18 = sshll.u32 %s121_s14, 3  ;;  %s275_s21 = sshll.u32 %s469_s12, 7 }
  0x2e   : > { %p35_p13 = por %p34_p2, %p705_p12  ;;  %s594_s19 = scalar_lea.hbm %s690_s0, %s275_s21 }
  0x2f   : > { %s125_s23 = scalar_lea.vmem [#allocation2], %s274_s18  ;;  %s122_s27 = scalar_lea.sflag [#allocation3], %s121_s14 }
  0x30   : > { %s132_s24 = sshll.u32 %s125_s23, 4  ;;  %p596_p11 = pnand %p305_p9, %p35_p13  ;;  %s600_s24 = int_to_ptr.vmem [resolvable:$true] %s132_s24 }
  0x31   : > { %s369_s28 = scalar_lea.hbm %s594_s19, 128  ;;  %s374_s3 = scalar_lea.hbm %s690_s0, 256 }
  0x32   : > { %p370_p0 = scmp.ne.s32.totalorder %s594_s19, %s369_s28  ;;  %p371_p3 = pneg %p596_p11 }
  0x33   : > { %p375_p10 = scmp.lt.u32.totalorder %s594_s19, %s690_s0  ;;  %p376_p1 = scmp.lt.u32.totalorder %s374_s3, %s369_s28 }
  0x34   : > { %p372_p5 = pnand %p371_p3, %p370_p0  ;;  %p378_p4 = scmp.lt.u32.totalorder %s369_s28, %s594_s19 }
  0x35   : > { %p377_p2 = por %p376_p1, %p375_p10 }
  0x36   : > { %p373_p7 = pneg %p372_p5 }
  0x37   : > { %p379_p6 = por %p378_p4, %p377_p2 }
  0x39   : > { %p380_p9 = pnand %p379_p6, %p373_p7 }
  0x3b   : > { %383 = shalt.err (!%p380_p9)
}
  0x3c   : > { %s384_s6 = scalar_lea.vmem %s600_s24, 128  ;;  %s472_s14 = smov [#allocation2]  }
  0x3d   : > { %p385_p12 = scmp.ne.s32.totalorder %s600_s24, %s384_s6  ;;  %s389_s18 = sshll.u32 %s472_s14, 4  ;;  %s390_s18 = int_to_ptr.vmem [resolvable:$false] %s389_s18 }
  0x3e   : > { %s391_s21 = scalar_lea.vmem %s390_s18, 256  ;;  %p392_p5 = scmp.lt.s32.totalorder %s600_s24, %s390_s18 }
  0x3f   : > { %p387_p13 = pnand %p385_p12, %p371_p3  ;;  %p393_p10 = scmp.lt.s32.totalorder %s391_s21, %s384_s6 }
  0x41   : > { %p388_p0 = pneg %p387_p13  ;;  %p394_p1 = por %p393_p10, %p392_p5 }
  0x43   : > { %p395_p2 = pnand %p394_p1, %p388_p0 }
  0x45   : > { %398 = shalt.err (!%p395_p2)
}
  0x46   : > { %299 = dma.hbm_to_vmem [thread:$0]  (!%p596_p11), %s594_s19, 128, %s600_s24, %s122_s27  }
  0x47   : > { %p707_p7 = scmp.ne.s32.totalorder %s698_s17, 0 }
  0x48   : > { %s630_s22 = sand.u32 (!%p707_p7), 1, %s461_s10   ;;  %p708_p3 = scmp.ne.s32.totalorder (!%p707_p7), %s696_s15, 0 }
  0x49   : > { %141 = sbr.rel (%p707_p7) target bundleno = 109 (0x6d), region = 28  ;;  %s277_s25 = sshll.u32 (!%p707_p7), %s630_s22, 3 }
  0x4a   : > { %s144_s23 = scalar_lea.sflag (!%p707_p7), [#allocation3], %s630_s22  ;;  %s147_s28 = scalar_lea.vmem (!%p707_p7), [#allocation2], %s277_s25 }
  0x50   : > { %444 = dma.done.wait (%p708_p3), %s144_s23, 128  }
  0x51   : > { %446 = vsyncadd (%p708_p3), %s144_s23, 4294967168  ;;  %p709_p4 = scmp.eq.s32.totalorder %s510_s13, 0 }
  0x53   : > { %448 = dma.done.wait (%p709_p4), [#allocation6], 128   ;;  %p710_p11 = pmov %p709_p4 }
  0x54   : > { %s171_s17 = scalar_lea.vmem [#allocation7], %s277_s25  ;;  %s281_s24 = sshll.u32 %s510_s13, 7  ;;  %v172_v0 = vld [vmem:[%s147_s28] sm:$0xff]  ;;  %v173_v1 = vld [vmem:[#allocation5] sm:$0xff] }
  0x55   : > { %450 = vsyncadd (%p710_p11), [#allocation6], 4294967168  ;;  %s190_s19 = sshll.u32 %s171_s17, 4  ;;  %v174_v2 = vadd.f32 %v173_v1, %v172_v0  ;;  %s648_s27 = scalar_lea.hbm %s692_s2, %s281_s24  ;;  %s643_s19 = int_to_ptr.vmem [resolvable:$true] %s190_s19 }
  0x56   : > { %s177_s29 = scalar_lea.sflag [#allocation4], %s630_s22  ;;  %s399_s30 = scalar_lea.vmem %s643_s19, 128 }
  0x57   : > { %175 = vst [vmem:[%s171_s17] sm:$0xff] %v174_v2  ;;  %p400_p6 = scmp.ne.s32.totalorder %s643_s19, %s399_s30  ;;  %s473_s13 = smov [#allocation7]  }
  0x58   : > { %s403_s3 = sshll.u32 %s473_s13, 4  ;;  %s404_s3 = int_to_ptr.vmem [resolvable:$false] %s403_s3 }
  0x59   : > { %p401_p9 = pnand %p400_p6, %p581_p8  ;;  %s405_s4 = scalar_lea.vmem %s404_s3, 256 }
  0x5a   : > { %p406_p13 = scmp.lt.s32.totalorder %s643_s19, %s404_s3  ;;  %p407_p0 = scmp.lt.s32.totalorder %s405_s4, %s399_s30 }
  0x5b   : > { %p402_p12 = pneg %p401_p9 }
  0x5c   : > { %p408_p5 = por %p407_p0, %p406_p13 }
  0x5e   : > { %p409_p10 = pnand %p408_p5, %p402_p12 }
  0x60   : > { %412 = shalt.err (!%p409_p10)
}
  0x61   : > { %s413_s5 = scalar_lea.hbm %s648_s27, 128  ;;  %s417_s18 = scalar_lea.hbm %s692_s2, 256 }
  0x62   : > { %p414_p1 = scmp.ne.s32.totalorder %s648_s27, %s413_s5  ;;  %p418_p3 = scmp.lt.u32.totalorder %s648_s27, %s692_s2 }
  0x63   : > { %p419_p4 = scmp.lt.u32.totalorder %s417_s18, %s413_s5  ;;  %p421_p6 = scmp.lt.u32.totalorder %s413_s5, %s648_s27 }
  0x64   : > { %p415_p2 = pnand %p414_p1, %p581_p8 }
  0x65   : > { %p420_p11 = por %p419_p4, %p418_p3 }
  0x66   : > { %p416_p7 = pneg %p415_p2 }
  0x67   : > { %p422_p9 = por %p421_p6, %p420_p11 }
  0x69   : > { %p423_p12 = pnand %p422_p9, %p416_p7 }
  0x6b   : > { %426 = shalt.err (!%p423_p12)
}
  0x6c   : > { %290 = dma.vmem_to_hbm [thread:$0]  (%p581_p8), %s643_s19, 128, %s648_s27, %s177_s29  }
  0x6d PF: > { %s202_s25 = sand.u32 1, %s457_s9   ;;  %p711_p13 = scmp.ne.s32.totalorder %s697_s16, 0 }
  0x6e   : > { %p712_p0 = scmp.ge.s32.totalorder %s469_s12, 2  ;;  %s203_s23 = scalar_lea.sflag [#allocation4], %s202_s25 }
  0x70   : > { %p301_p5 = pnand %p712_p0, %p711_p13 }
  0x72   : > { %452 = dma.done.wait (!%p301_p5), %s203_s23, 128  }
  0x73   : > { %454 = vsyncadd (!%p301_p5), %s203_s23, 4294967168  ;;  %p16_p10 = scmp.ge.s32.totalorder %s537_s20, 4   ;;  %s713_s9 = smov %s461_s10 }
  0x74   : > { %s714_s10 = smov %s465_s11  ;;  %s715_s11 = smov %s573_s7 }
  0x75   : > { %s716_s12 = smov %s537_s20  ;;  %18 = sbr.rel (!%p16_p10) target bundleno = 6 (0x6), region = 77 }
  0x7c   :  { %208 = vsyncpa [#allocation3], 1 }
  0x7d   :  { %210 = vsyncpa [#allocation3 + $0x1], 1 }
  0x7e   :  { %211 = vsyncpa [#allocation6], 1 }
  0x7f   :  { %212 = vsyncpa [#allocation4], 1 }
  0x80   :  { %214 = vsyncpa [#allocation4 + $0x1], 1 }

// kernel: _forward_jit.1
= control target key start
LH: loop header
LB: loop body
LE: loop exit
PB: predicated region body
PF: predicated region fallthrough
CT: control target
= control target key end

     0   :  { %13 = vsyncpa [#allocation3], 0  ;;  %s981_s0 = inlined_call_operand.vmem [shape: bf16[16,32], index: 0, kind: input, shape index: {}]   ;;  %s982_s1 = inlined_call_operand.hbm [shape: bf16[32,256], index: 1, kind: input, shape index: {}]   ;;  %s983_s2 = inlined_call_operand.vmem [shape: f32[1,256], index: 2, kind: input, shape index: {}]   ;;  %s984_s3 = inlined_call_operand.hbm [shape: bf16[256,256], index: 3, kind: input, shape index: {}]   ;;  %s985_s4 = inlined_call_operand.vmem [shape: f32[1,256], index: 4, kind: input, shape index: {}]   ;;  %s986_s5 = inlined_call_operand.hbm [shape: bf16[256,128], index: 5, kind: input, shape index: {}]   ;;  %s987_s6 = inlined_call_operand.vmem [shape: f32[1,128], index: 6, kind: input, shape index: {}]   ;;  %s988_s7 = inlined_call_operand.vmem [shape: f32[1,128], index: 7, kind: input, shape index: {}]   ;;  %s989_s8 = inlined_call_operand.vmem [shape: f32[16,128], index: 8, kind: output, shape index: {}]  }
   0x1   :  { %14 = vsyncpa [#allocation5], 0  ;;  %s864_s27 = smov [#allocation4]   ;;  %s865_s29 = smov [#allocation2]  }
   0x2   :  { %s36_s28 = sshll.u32 %s864_s27, 4  ;;  %s22_s30 = sshll.u32 %s865_s29, 4  ;;  %s37_s28 = int_to_ptr.vmem [resolvable:$true] %s36_s28  ;;  %s917_s30 = int_to_ptr.vmem [resolvable:$true] %s22_s30 }
   0x3   :  { %s794_s11 = scalar_lea.hbm %s984_s3, 4096 }
   0x4   :  { %p795_p0 = scmp.ne.s32.totalorder %s984_s3, %s794_s11  ;;  %p798_p1 = scmp.lt.u32.totalorder %s794_s11, %s984_s3 }
   0x6   :  { %p800_p2 = pnand %p798_p1, %p795_p0 }
   0x8   :  { %803 = shalt.err (!%p800_p2)
}
   0x9   :  { %s804_s16 = scalar_lea.vmem %s37_s28, 4096  ;;  %p809_p4 = scmp.lt.s32.totalorder %s37_s28, %s37_s28 }
   0xa   :  { %p805_p3 = scmp.ne.s32.totalorder %s37_s28, %s804_s16  ;;  %p810_p5 = scmp.lt.s32.totalorder %s804_s16, %s804_s16 }
   0xc   :  { %p811_p6 = por %p810_p5, %p809_p4 }
   0xe   :  { %p812_p7 = pnand %p811_p6, %p805_p3 }
  0x10   :  { %815 = shalt.err (!%p812_p7)
}
  0x11   :  { %s866_s17 = smov 128   ;;  %s867_s18 = smov 8  }
  0x12   :  { %42 = dma.hbm_to_vmem [thread:$0]  %s984_s3, 4096, %s37_s28, [#allocation5], %s866_s17, %s866_s17, %s867_s18  }
  0x13   :  { %s816_s23 = scalar_lea.hbm %s982_s1, 512 }
  0x14   :  { %p817_p8 = scmp.ne.s32.totalorder %s982_s1, %s816_s23  ;;  %p820_p9 = scmp.lt.u32.totalorder %s816_s23, %s982_s1 }
  0x16   :  { %p822_p10 = pnand %p820_p9, %p817_p8 }
  0x18   :  { %825 = shalt.err (!%p822_p10)
}
  0x19   :  { %s826_s29 = scalar_lea.vmem %s917_s30, 512  ;;  %p831_p12 = scmp.lt.s32.totalorder %s917_s30, %s917_s30 }
  0x1a   :  { %p827_p11 = scmp.ne.s32.totalorder %s917_s30, %s826_s29  ;;  %p832_p13 = scmp.lt.s32.totalorder %s826_s29, %s826_s29 }
  0x1c   :  { %p833_p0 = por %p832_p13, %p831_p12 }
  0x1e   :  { %p834_p1 = pnand %p833_p0, %p827_p11 }
  0x20   :  { %837 = shalt.err (!%p834_p1)
}
  0x21   :  { %28 = dma.hbm_to_vmem [thread:$0]  %s982_s1, 512, %s917_s30, [#allocation3], %s866_s17, %s866_s17, %s867_s18  }
  0x22   :  { %s868_s9 = smov [#allocation6]   ;;  %s838_s13 = scalar_lea.hbm %s986_s5, 2048 }
  0x23   :  { %s50_s10 = sshll.u32 %s868_s9, 4  ;;  %p839_p2 = scmp.ne.s32.totalorder %s986_s5, %s838_s13  ;;  %s51_s10 = int_to_ptr.vmem [resolvable:$true] %s50_s10 }
  0x24   :  { %p842_p3 = scmp.lt.u32.totalorder %s838_s13, %s986_s5 }
  0x26   :  { %p844_p4 = pnand %p842_p3, %p839_p2 }
  0x28   :  { %847 = shalt.err (!%p844_p4)
}
  0x29   :  { %s848_s20 = scalar_lea.vmem %s51_s10, 2048  ;;  %p853_p6 = scmp.lt.s32.totalorder %s51_s10, %s51_s10 }
  0x2a   :  { %p849_p5 = scmp.ne.s32.totalorder %s51_s10, %s848_s20  ;;  %p854_p7 = scmp.lt.s32.totalorder %s848_s20, %s848_s20 }
  0x2c   :  { %p855_p8 = por %p854_p7, %p853_p6 }
  0x2e   :  { %p856_p9 = pnand %p855_p8, %p849_p5 }
  0x30   :  { %859 = shalt.err (!%p856_p9)
}
  0x31   :  { %s869_s1 = smov 64   ;;  %s870_s30 = smov 4  }
  0x32   :  { %56 = dma.hbm_to_vmem [thread:$0]  %s986_s5, 2048, %s51_s10, [#allocation5], %s869_s1, %s869_s1, %s870_s30  }
  0x33   :  { %860 = dma.done.wait [#allocation3], 512  }
  0x34   :  { %861 = vsyncadd [#allocation3], 4294966784 }
  0x35   :  { %862 = dma.done.wait [#allocation5], 6144  }
  0x36   :  { %863 = vsyncadd [#allocation5], 4294961152  ;;  %v871_v0 = vmov 0   ;;  %v715_v1 = vld [vmem:[#allocation2 + $0x4] ss:$8 sps:$4 sm:$0xff]   ;;  %vm114_vm0 = vcmask 261120   ;;  %v79_v49 = vlaneseq }
  0x37   :  { %150 = vmatprep.mubr.bf16.mxu0 %v871_v0  ;;  %v717_v2 = vld [vmem:[#allocation2] ss:$8 sps:$4 sm:$0xff]   ;;  %118 = vmatprep.subr.bf16.mxu0 %v715_v1  ;;  %v718_v3 = vld [vmem:[#allocation2 + $0x14] ss:$8 sps:$4 sm:$0xff]   ;;  %v720_v4 = vld [vmem:[#allocation2 + $0x10] ss:$8 sps:$4 sm:$0xff]  }
  0x38   :  { %119 = vmatpush1.bf16.msra.mxu0 %v717_v2  ;;  %v722_v5 = vld [vmem:[#allocation4 + $0x4] ss:$8 sps:$4 sm:$0xff]   ;;  %v724_v6 = vld [vmem:[#allocation4] ss:$8 sps:$4 sm:$0xff]   ;;  %v725_v7 = vld [vmem:[#allocation4 + $0x14] ss:$8 sps:$4 sm:$0xff]  }
  0x39   :  { %120 = vmatprep.subr.bf16.mxu0 %v718_v3  ;;  %v721_v8 = vld [vmem:[%s981_s0] sm:$0xff]   ;;  %371 = vmatprep.subr.bf16.mxu1 %v722_v5  ;;  %v727_v9 = vld [vmem:[#allocation4 + $0x10] ss:$8 sps:$4 sm:$0xff]   ;;  %v731_v12 = vld [vmem:[#allocation4 + $0x34] ss:$8 sps:$4 sm:$0xff]   ;;  %v80_v50 = vshrl.u32 %v79_v49, 7 }
  0x3a   :  { %372 = vmatpush1.bf16.msra.mxu1 %v724_v6  ;;  %v728_v10 = vld [vmem:[#allocation4 + $0x24] ss:$8 sps:$4 sm:$0xff]   ;;  %v730_v11 = vld [vmem:[#allocation4 + $0x20] ss:$8 sps:$4 sm:$0xff]   ;;  %v733_v13 = vld [vmem:[#allocation4 + $0x30] ss:$8 sps:$4 sm:$0xff]  }
  0x3b   :  { %373 = vmatprep.subr.bf16.mxu1 %v725_v7  ;;  %v734_v14 = vld [vmem:[#allocation4 + $0x44] ss:$8 sps:$4 sm:$0xff]   ;;  %v736_v15 = vld [vmem:[#allocation4 + $0x40] ss:$8 sps:$4 sm:$0xff]   ;;  %v737_v16 = vld [vmem:[#allocation4 + $0x54] ss:$8 sps:$4 sm:$0xff]  }
  0x3c   :  { %121 = vmatpush1.bf16.msra.mxu0 %v720_v4  ;;  %v739_v17 = vld [vmem:[#allocation4 + $0x50] ss:$8 sps:$4 sm:$0xff]   ;;  %v740_v18 = vld [vmem:[#allocation4 + $0x64] ss:$8 sps:$4 sm:$0xff]   ;;  %v742_v19 = vld [vmem:[#allocation4 + $0x60] ss:$8 sps:$4 sm:$0xff]  }
  0x3d   :  { %v743_v20 = vld [vmem:[#allocation4 + $0x74] ss:$8 sps:$4 sm:$0xff]   ;;  %v745_v21 = vld [vmem:[#allocation4 + $0x70] ss:$8 sps:$4 sm:$0xff]   ;;  %v746_v22 = vld [vmem:[#allocation4 + $0x84] ss:$8 sps:$4 sm:$0xff]  }
  0x3e   :  { %374 = vmatpush1.bf16.msra.mxu1 %v727_v9  ;;  %v748_v23 = vld [vmem:[#allocation4 + $0x80] ss:$8 sps:$4 sm:$0xff]   ;;  %v749_v24 = vld [vmem:[#allocation4 + $0x94] ss:$8 sps:$4 sm:$0xff]   ;;  %v751_v25 = vld [vmem:[#allocation4 + $0x90] ss:$8 sps:$4 sm:$0xff]  }
  0x3f   :  { %634 = vmatmul.mubr.msk.bf16.vlgmr.msra.gmra.mrb[0].mxu0 %vm114_vm0, %v721_v8  ;;  %375 = vmatprep.subr.bf16.mxu1 %v728_v10  ;;  %v752_v26 = vld [vmem:[#allocation4 + $0xa4] ss:$8 sps:$4 sm:$0xff]   ;;  %v754_v27 = vld [vmem:[#allocation4 + $0xa0] ss:$8 sps:$4 sm:$0xff]   ;;  %v755_v28 = vld [vmem:[#allocation4 + $0xb4] ss:$8 sps:$4 sm:$0xff]  }
  0x40   :  { %v757_v29 = vld [vmem:[#allocation4 + $0xb0] ss:$8 sps:$4 sm:$0xff]   ;;  %v758_v30 = vld [vmem:[#allocation4 + $0xc4] ss:$8 sps:$4 sm:$0xff]   ;;  %v760_v31 = vld [vmem:[#allocation4 + $0xc0] ss:$8 sps:$4 sm:$0xff]  }
  0x41   :  { %v761_v32 = vld [vmem:[#allocation4 + $0xd4] ss:$8 sps:$4 sm:$0xff]   ;;  %v763_v33 = vld [vmem:[#allocation4 + $0xd0] ss:$8 sps:$4 sm:$0xff]   ;;  %v764_v34 = vld [vmem:[#allocation4 + $0xe4] ss:$8 sps:$4 sm:$0xff]  }
  0x42   :  { %376 = vmatpush1.bf16.msra.mxu1 %v730_v11  ;;  %v766_v35 = vld [vmem:[#allocation4 + $0xe0] ss:$8 sps:$4 sm:$0xff]   ;;  %v767_v36 = vld [vmem:[#allocation4 + $0xf4] ss:$8 sps:$4 sm:$0xff]   ;;  %v769_v37 = vld [vmem:[#allocation4 + $0xf0] ss:$8 sps:$4 sm:$0xff]  }
  0x43   :  { %377 = vmatprep.subr.bf16.mxu1 %v731_v12  ;;  %v770_v38 = vld [vmem:[#allocation6 + $0x40] sm:$0xff]   ;;  %v772_v40 = vld [vmem:[#allocation6 + $0x48] sm:$0xff]   ;;  %v774_v42 = vld [vmem:[#allocation6 + $0x50] sm:$0xff]   ;;  %v81_v51 = vsub.s32 0, %v80_v50  ;;  %v85_v53 = vsub.s32 1, %v80_v50 }
  0x44   :  { %v771_v39 = vld [vmem:[#allocation6] sm:$0xff]   ;;  %685 = vmatprep.subr.bf16.mxu0 %v770_v38  ;;  %v773_v41 = vld [vmem:[#allocation6 + $0x8] sm:$0xff]   ;;  %v775_v43 = vld [vmem:[#allocation6 + $0x10] sm:$0xff]  }
  0x45   :  { %686 = vmatpush3.bf16.msra.mxu0 %v771_v39  ;;  %v776_v44 = vld [vmem:[#allocation6 + $0x58] sm:$0xff]   ;;  %v778_v46 = vld [vmem:[#allocation6 + $0x60] sm:$0xff]   ;;  %v780_v48 = vld [vmem:[#allocation6 + $0x68] sm:$0xff]  }
  0x46   :  { %378 = vmatpush1.bf16.msra.mxu1 %v733_v13  ;;  %687 = vmatprep.subr.bf16.mxu0 %v772_v40  ;;  %v777_v45 = vld [vmem:[#allocation6 + $0x18] sm:$0xff]   ;;  %v779_v47 = vld [vmem:[#allocation6 + $0x20] sm:$0xff]   ;;  %v781_v6 = vld [vmem:[#allocation6 + $0x28] sm:$0xff]  }
  0x47   :  { %379 = vmatprep.subr.bf16.mxu1 %v734_v14  ;;  %v77_v52 = vld [vmem:[%s983_s2] sm:$0x3]  ;;  %v782_v7 = vld [vmem:[#allocation6 + $0x70] sm:$0xff]   ;;  %v784_v9 = vld [vmem:[#allocation6 + $0x78] sm:$0xff]  }
  0x48   :  { %v82_v54 = vrot.slane %v77_v52, %v81_v51  ;;  %v86_v55 = vrot.slane %v77_v52, %v85_v53  ;;  %v783_v8 = vld [vmem:[#allocation6 + $0x30] sm:$0xff]   ;;  %v785_v10 = vld [vmem:[#allocation6 + $0x38] sm:$0xff]   ;;  %v199_v11 = vld [vmem:[%s985_s4] sm:$0x3] }
  0x49   :  { %688 = vmatpush3.bf16.msra.mxu0 %v773_v41  ;;  %v204_v12 = vrot.slane %v199_v11, %v81_v51  ;;  %v208_v13 = vrot.slane %v199_v11, %v85_v53 }
  0x4a   :  { %380 = vmatpush1.bf16.msra.mxu1 %v736_v15  ;;  %689 = vmatprep.subr.bf16.mxu0 %v774_v42 }
  0x4b   :  { %381 = vmatprep.subr.bf16.mxu1 %v737_v16 }
  0x4d   :  { %690 = vmatpush3.bf16.msra.mxu0 %v775_v43 }
  0x4e   :  { %382 = vmatpush1.bf16.msra.mxu1 %v739_v17  ;;  %691 = vmatprep.subr.bf16.mxu0 %v776_v44 }
  0x4f   :  { %383 = vmatprep.subr.bf16.mxu1 %v740_v18 }
  0x51   :  { %692 = vmatpush3.bf16.msra.mxu0 %v777_v45 }
  0x52   :  { %384 = vmatpush1.bf16.msra.mxu1 %v742_v19  ;;  %693 = vmatprep.subr.bf16.mxu0 %v778_v46 }
  0x53   :  { %385 = vmatprep.subr.bf16.mxu1 %v743_v20 }
  0x55   :  { %694 = vmatpush3.bf16.msra.mxu0 %v779_v47 }
  0x56   :  { %386 = vmatpush1.bf16.msra.mxu1 %v745_v21  ;;  %695 = vmatprep.subr.bf16.mxu0 %v780_v48 }
  0x57   :  { %387 = vmatprep.subr.bf16.mxu1 %v746_v22 }
  0x59   :  { %696 = vmatpush3.bf16.msra.mxu0 %v781_v6 }
  0x5a   :  { %388 = vmatpush1.bf16.msra.mxu1 %v748_v23  ;;  %697 = vmatprep.subr.bf16.mxu0 %v782_v7 }
  0x5b   :  { %389 = vmatprep.subr.bf16.mxu1 %v749_v24 }
  0x5d   :  { %698 = vmatpush3.bf16.msra.mxu0 %v783_v8 }
  0x5e   :  { %390 = vmatpush1.bf16.msra.mxu1 %v751_v25  ;;  %699 = vmatprep.subr.bf16.mxu0 %v784_v9 }
  0x5f   :  { %391 = vmatprep.subr.bf16.mxu1 %v752_v26 }
  0x61   :  { %700 = vmatpush3.bf16.msra.mxu0 %v785_v10 }
  0x62   :  { %392 = vmatpush1.bf16.msra.mxu1 %v754_v27 }
  0x63   :  { %393 = vmatprep.subr.bf16.mxu1 %v755_v28 }
  0x66   :  { %394 = vmatpush1.bf16.msra.mxu1 %v757_v29  ;;  %v667_v29 = vld [vmem:[%s987_s6] ss:$0 sm:$0xff] }
  0x67   :  { %395 = vmatprep.subr.bf16.mxu1 %v758_v30 }
  0x6a   :  { %396 = vmatpush1.bf16.msra.mxu1 %v760_v31 }
  0x6b   :  { %397 = vmatprep.subr.bf16.mxu1 %v761_v32 }
  0x6e   :  { %398 = vmatpush1.bf16.msra.mxu1 %v763_v33  ;;  %v684_v33 = vld [vmem:[%s988_s7] ss:$0 sm:$0xff] }
  0x6f   :  { %399 = vmatprep.subr.bf16.mxu1 %v764_v34 }
  0x72   :  { %400 = vmatpush1.bf16.msra.mxu1 %v766_v35 }
  0x73   :  { %401 = vmatprep.subr.bf16.mxu1 %v767_v36 }
  0x76   :  { %402 = vmatpush1.bf16.msra.mxu1 %v769_v37 }
 0x112   :  { %v152_v56 = vpop.f32.mrb[0].mxu0 }
 0x113   :  { %v153_v57 = vadd.f32 %v152_v56, %v82_v54  ;;  %v154_v58 = vpop.f32.mrb[1].mxu0 }
 0x114   :  { %v155_v59 = vadd.f32 %v154_v58, %v86_v55  ;;  %v156_v60 = vpop.f32.mrb[2].mxu0 }
 0x115   :  { %v157_v61 = vadd.f32 %v156_v60, %v82_v54  ;;  %v158_v62 = vpop.f32.mrb[3].mxu0  ;;  %v161_v0 = vmax.f32 %v153_v57, 0.0 }
 0x116   :  { %v159_v63 = vadd.f32 %v158_v62, %v86_v55  ;;  %v162_v2 = vmax.f32 %v155_v59, 0.0 }
 0x117   :  { %v163_v1 = vmax.f32 %v157_v61, 0.0 }
 0x118   :  { %v164_v3 = vmax.f32 %v159_v63, 0.0 }
 0x119   :  { %v165_v4 = vpack.c.bf16 %v163_v1, %v161_v0 }
 0x11a   :  { %v166_v5 = vpack.c.bf16 %v164_v3, %v162_v2 }
 0x11c   :  { %403 = vmatprep.mubr.bf16.mxu1 %v166_v5 }
 0x11d   :  { %404 = vmatmul.mubr.bf16.vlgmr.msra.gmra.mrb[0].mxu1 %v165_v4 }
 0x1f0   :  { %v405_v14 = vpop.f32.mrb[0].mxu1 }
 0x1f1   :  { %v406_v15 = vadd.f32 %v405_v14, %v204_v12  ;;  %v407_v16 = vpop.f32.mrb[1].mxu1 }
 0x1f2   :  { %v408_v17 = vadd.f32 %v407_v16, %v208_v13  ;;  %v409_v18 = vpop.f32.mrb[2].mxu1 }
 0x1f3   :  { %v410_v19 = vadd.f32 %v409_v18, %v204_v12  ;;  %v411_v20 = vpop.f32.mrb[3].mxu1  ;;  %v414_v22 = vmax.f32 %v406_v15, 0.0 }
 0x1f4   :  { %v412_v21 = vadd.f32 %v411_v20, %v208_v13  ;;  %v415_v24 = vmax.f32 %v408_v17, 0.0 }
 0x1f5   :  { %v416_v23 = vmax.f32 %v410_v19, 0.0 }
 0x1f6   :  { %v417_v25 = vmax.f32 %v412_v21, 0.0 }
 0x1f7   :  { %v418_v26 = vpack.c.bf16 %v416_v23, %v414_v22 }
 0x1f8   :  { %v419_v27 = vpack.c.bf16 %v417_v25, %v415_v24 }
 0x1fa   :  { %587 = vmatprep.mubr.bf16.mxu0 %v419_v27 }
 0x1fb   :  { %588 = vmatmul.mubr.bf16.vlgmr.msra.gmra.mrb[4].mxu0 %v418_v26 }
 0x2ce   :  { %v701_v28 = vpop.f32.mrb[4].mxu0 }
 0x2cf   :  { %v702_v30 = vpop.f32.mrb[5].mxu0 }
 0x2d0   :  { %v703_v31 = vadd.f32 %v702_v30, %v701_v28  ;;  %v704_v32 = vpop.f32.mrb[6].mxu0 }
 0x2d1   :  { %v705_v34 = vpop.f32.mrb[7].mxu0 }
 0x2d2   :  { %v590_v35 = vadd.f32 %v703_v31, %v667_v29  ;;  %v706_v36 = vadd.f32 %v705_v34, %v704_v32 }
 0x2d4   :  { %v603_v37 = vmul.f32 %v684_v33, %v590_v35  ;;  %v593_v38 = vadd.f32 %v706_v36, %v667_v29 }
 0x2d6   :  { %v605_v39 = vsub.f32 0.0, %v603_v37  ;;  %v604_v40 = vmul.f32 %v684_v33, %v593_v38 }
 0x2d8   :  { %v607_v41 = vmul.f32 1.442695, %v605_v39  ;;  %v606_v42 = vsub.f32 0.0, %v604_v40 }
 0x2da   :  { %786 = vpow2.f32 %v607_v41  ;;  %v609_v43 = vmul.f32 1.442695, %v606_v42 }
 0x2dc   :  { %788 = vpow2.f32 %v609_v43 }
 0x2e4   :  { %v787_v44 = vpop.eup %786 }
 0x2e5   :  { %v611_v45 = vadd.f32 1.0, %v787_v44 }
 0x2e6   :  { %v789_v46 = vpop.eup %788 }
 0x2e7   :  { %790 = vrcp.f32 %v611_v45  ;;  %v612_v47 = vadd.f32 1.0, %v789_v46 }
 0x2e9   :  { %792 = vrcp.f32 %v612_v47 }
 0x2f1   :  { %v791_v48 = vpop.eup %790 }
 0x2f2   :  { %v615_v49 = vsub.f32 %v791_v48, %v590_v35 }
 0x2f3   :  { %v793_v50 = vpop.eup %792 }
 0x2f4   :  { %v617_v51 = vmul.f32 %v684_v33, %v615_v49  ;;  %v616_v52 = vsub.f32 %v793_v50, %v593_v38 }
 0x2f6   :  { %v619_v53 = vadd.f32 %v617_v51, %v590_v35  ;;  %v618_v54 = vmul.f32 %v684_v33, %v616_v52 }
 0x2f8   :  { %621 = vst [vmem:[%s989_s8] sm:$0xff] %v619_v53  ;;  %v620_v55 = vadd.f32 %v618_v54, %v593_v38 }
 0x2fa   :  { %622 = vst [vmem:[%s989_s8 + $0x8] sm:$0xff] %v620_v55 }
 0x2fb   :  { %627 = vsyncpa [#allocation3], 1 }
 0x2fc   :  { %628 = vsyncpa [#allocation5], 1 }

</bundles_post_ra>
